<compile_context>
chip_gen: v6e
topology: v6e:2x2x1
jax: 0.10.0
libtpu: 0.0.40
codegen_flags: <defaults>
</compile_context>

<pallas_src>
import jax
import jax.numpy as jnp
import numpy as np
from jax.experimental import pallas as pl
from jax.experimental.pallas import tpu as pltpu


# ---------------------------------------------------------------------------
# Kernel
# ---------------------------------------------------------------------------
# Folded constants (exact in binary floating point):
#   t = (t_raw + 1) * 127.5, o likewise
#   rmean = 63.75*(t0_raw + o0_raw) + 127.5
#   sqrt((512+rmean)*r^2/256 + 4*g^2 + (767-rmean)*b^2/256)
#     = 127.5 * sqrt((A + B*s)*dr^2 + 4*dg^2 + (A - B*s)*db^2)
#   with s = t0_raw + o0_raw, A = 639.5/256, B = 63.75/256.
_A = 639.5 / 256.0       # = 2.498046875  (exact)
_B = 63.75 / 256.0       # = 0.2490234375 (exact)
_SCALE = 127.5

_LANE = 512              # lane-dense width (multiple of 128)


def _perceptual_kernel(t_ref, o_ref, out_ref):
    # t_ref / o_ref: (3, TR, LANE) planar R,G,B tiles (original dtype)
    # out_ref:       (TR, LANE)
    f32 = jnp.float32
    t0 = t_ref[0].astype(f32)
    o0 = o_ref[0].astype(f32)
    t1 = t_ref[1].astype(f32)
    o1 = o_ref[1].astype(f32)
    t2 = t_ref[2].astype(f32)
    o2 = o_ref[2].astype(f32)

    s = t0 + o0
    dr = t0 - o0
    dg = t1 - o1
    db = t2 - o2

    w = _B * s
    inner = (_A + w) * (dr * dr) + 4.0 * (dg * dg) + (_A - w) * (db * db)
    out_ref[...] = (_SCALE * jnp.sqrt(inner)).astype(out_ref.dtype)


# ---------------------------------------------------------------------------
# Helpers
# ---------------------------------------------------------------------------
def _round_up(x, m):
    return ((x + m - 1) // m) * m


def _cdiv(a, b):
    return -(-a // b)


def _chip_defaults():
    """(max_tile_rows, vmem_limit_bytes) picked per TPU generation."""
    kind = ""
    try:
        kind = jax.devices()[0].device_kind.lower()
    except Exception:
        pass
    if "v7" in kind or "7x" in kind:
        # v7x: ~3.2 TB/s HBM, 64 MiB VMEM/TC -> bigger steps, raised limit.
        return 1024, 40 * 1024 * 1024
    # v5e / v6e (128 MiB physical VMEM); 512-row f32 tiles ~= 14 MiB live.
    return 512, 32 * 1024 * 1024


def _pick_tile_rows(rows, max_tr, sublane):
    """Tile rows: <= max_tr, sublane-aligned unless it equals the full array,
    and split into >=2 grid steps when possible (v7x megacore)."""
    if rows > max_tr:
        return max_tr
    half = _round_up(_cdiv(rows, 2), sublane)
    if half < rows:
        return half          # >= 2 grid steps, aligned full first block
    return rows              # single full-array block (no alignment needed)


# ---------------------------------------------------------------------------
# Pallas callers
# ---------------------------------------------------------------------------
def _redmean_pallas(t_pl, o_pl, *, allow_input_fusion=False,
                    out_dtype=jnp.float32):
    """t_pl, o_pl: (3, rows, _LANE) planar tiles; returns (rows, _LANE)."""
    _, rows, lane = t_pl.shape
    assert lane == _LANE

    max_tr, vmem_limit = _chip_defaults()
    itemsize = jnp.dtype(t_pl.dtype).itemsize
    sublane = {4: 8, 2: 16, 1: 32}.get(itemsize, 8)
    tr = _pick_tile_rows(rows, max_tr, sublane)
    grid = (_cdiv(rows, tr),)

    n_px = rows * _LANE
    cost = pl.CostEstimate(
        flops=12 * n_px,
        transcendentals=n_px,
        bytes_accessed=2 * 3 * n_px * itemsize
        + n_px * jnp.dtype(out_dtype).itemsize,
    )

    params = dict(dimension_semantics=("parallel",),
                  vmem_limit_bytes=vmem_limit)
    if allow_input_fusion:
        # Let XLA fuse the channel-last -> planar transpose/pad producers into
        # the kernel's input DMA (removes their extra HBM round trip when the
        # TPU fusion pass accepts them).
        params["allow_input_fusion"] = [True, True]

    in_spec = pl.BlockSpec((3, tr, _LANE), lambda i: (0, i, 0))
    out_spec = pl.BlockSpec((tr, _LANE), lambda i: (i, 0))

    return pl.pallas_call(
        _perceptual_kernel,
        out_shape=jax.ShapeDtypeStruct((rows, _LANE), out_dtype),
        grid=grid,
        in_specs=[in_spec, in_spec],
        out_specs=out_spec,
        compiler_params=pltpu.CompilerParams(**params),
        cost_estimate=cost,
    )(t_pl, o_pl)


def perceptual_loss_planar(targets_planar, outputs_planar, *,
                           allow_input_fusion=False):
    """Planar entry point: inputs are [3, P] (R, G, B planes over P pixels).

    Producers that can emit this layout directly avoid the channel-last
    transpose and its extra HBM round trip entirely.  Returns the per-pixel
    redmean distance [P] (float32).
    """
    assert targets_planar.shape == outputs_planar.shape
    c, p = targets_planar.shape
    assert c == 3

    rows = _cdiv(p, _LANE)
    p_pad = rows * _LANE

    def prep(x):
        if p_pad != p:
            x = jnp.pad(x, ((0, 0), (0, p_pad - p)))
        return x.reshape(3, rows, _LANE)

    out = _redmean_pallas(prep(targets_planar), prep(outputs_planar),
                          allow_input_fusion=allow_input_fusion)
    out = out.reshape(p_pad)
    return out if p_pad == p else out[:p]


def perceptual_loss(targets, outputs, *, allow_input_fusion=False):
    """targets, outputs: [B, H, W, C] (C >= 3, channels R,G,B first).

    Returns the per-pixel redmean distance map [B, H, W] (float32), matching
    the PyTorch module's forward (no reduction).
    """
    assert targets.shape == outputs.shape
    B, H, W, C = targets.shape
    assert C >= 3, "need at least 3 channels (R,G,B)"
    n = B * H * W

    # TODO(synk): if the producer can emit planar [3, B*H*W] data, call
    # perceptual_loss_planar directly and drop this transpose (it is one extra
    # HBM round trip for a memory-bound op); allow_input_fusion=True asks XLA
    # to fuse it into the kernel's input DMA instead.
    def planar(x):
        x = x[..., :3] if C != 3 else x
        return jnp.moveaxis(x.reshape(n, 3), -1, 0)   # [3, N], original dtype

    out = perceptual_loss_planar(planar(targets), planar(outputs),
                                 allow_input_fusion=allow_input_fusion)
    # TODO(synk): if the consumer immediately takes .mean(), fuse the (masked)
    # reduction into the kernel instead of writing the full map.
    return out.reshape(B, H, W)


# ---------------------------------------------------------------------------
# Reference + test
# ---------------------------------------------------------------------------
def _reference(targets, outputs):
    # Pure-JAX reference matching the PyTorch forward exactly.
    t = (targets.astype(jnp.float32) + 1.0) * 127.5
    o = (outputs.astype(jnp.float32) + 1.0) * 127.5
    rmean = (t[..., 0] + o[..., 0]) / 2
    r = t[..., 0] - o[..., 0]
    g = t[..., 1] - o[..., 1]
    b = t[..., 2] - o[..., 2]
    return jnp.sqrt(
        (512 + rmean) * r * r / 256 + 4 * g * g + (767 - rmean) * b * b / 256
    )


if __name__ == "__main__":
    key = jax.random.PRNGKey(0)
    k1, k2 = jax.random.split(key)
    B, H, W, C = 2, 16, 16, 3
    # inputs roughly in [-1, 1] like tanh-activated image generators
    targets = jnp.tanh(jax.random.normal(k1, (B, H, W, C), dtype=jnp.float32))
    outputs = jnp.tanh(jax.random.normal(k2, (B, H, W, C), dtype=jnp.float32))

    result = jax.block_until_ready(perceptual_loss(targets, outputs))
    ref = jax.block_until_ready(_reference(targets, outputs))

    assert result.shape == (B, H, W)
    # Constant folding reorders f32 rounding slightly vs. the reference.
    np.testing.assert_allclose(
        np.asarray(result), np.asarray(ref), rtol=1e-4, atol=1e-4
    )

    print("KERNEL_OK")
</pallas_src>

<mosaic_0001>
module attributes {stable_mosaic.version = 11 : i64} {
  func.func @_perceptual_kernel(%arg0: i32, %arg1: memref<3x1x512xf32, #tpu.memory_space<vmem>>, %arg2: memref<3x1x512xf32, #tpu.memory_space<vmem>>, %arg3: memref<1x512xf32, #tpu.memory_space<vmem>>) attributes {dimension_semantics = [#tpu.dimension_semantics<parallel>], iteration_bounds = array<i64: 1>, scalar_prefetch = 0 : i64, scratch_operands = 0 : i64, tpu.core_type = #tpu.core_type<tc>, window_params = [{transform_indices = @transform_0, window_bounds = array<i64: 3, 1, 512>}, {transform_indices = @transform_1, window_bounds = array<i64: 3, 1, 512>}, {transform_indices = @transform_2, window_bounds = array<i64: 1, 512>}]} {
    %c0 = arith.constant 0 : index
    %c0_0 = arith.constant 0 : index
    %c0_1 = arith.constant 0 : index
    %0 = vector.load %arg1[%c0, %c0_0, %c0_1] : memref<3x1x512xf32, #tpu.memory_space<vmem>>, vector<1x1x512xf32>
    %1 = vector.shape_cast %0 : vector<1x1x512xf32> to vector<1x512xf32>
    %c0_2 = arith.constant 0 : index
    %c0_3 = arith.constant 0 : index
    %c0_4 = arith.constant 0 : index
    %2 = vector.load %arg2[%c0_2, %c0_3, %c0_4] : memref<3x1x512xf32, #tpu.memory_space<vmem>>, vector<1x1x512xf32>
    %3 = vector.shape_cast %2 : vector<1x1x512xf32> to vector<1x512xf32>
    %c1 = arith.constant 1 : index
    %c0_5 = arith.constant 0 : index
    %c0_6 = arith.constant 0 : index
    %4 = vector.load %arg1[%c1, %c0_5, %c0_6] : memref<3x1x512xf32, #tpu.memory_space<vmem>>, vector<1x1x512xf32>
    %5 = vector.shape_cast %4 : vector<1x1x512xf32> to vector<1x512xf32>
    %c1_7 = arith.constant 1 : index
    %c0_8 = arith.constant 0 : index
    %c0_9 = arith.constant 0 : index
    %6 = vector.load %arg2[%c1_7, %c0_8, %c0_9] : memref<3x1x512xf32, #tpu.memory_space<vmem>>, vector<1x1x512xf32>
    %7 = vector.shape_cast %6 : vector<1x1x512xf32> to vector<1x512xf32>
    %c2 = arith.constant 2 : index
    %c0_10 = arith.constant 0 : index
    %c0_11 = arith.constant 0 : index
    %8 = vector.load %arg1[%c2, %c0_10, %c0_11] : memref<3x1x512xf32, #tpu.memory_space<vmem>>, vector<1x1x512xf32>
    %9 = vector.shape_cast %8 : vector<1x1x512xf32> to vector<1x512xf32>
    %c2_12 = arith.constant 2 : index
    %c0_13 = arith.constant 0 : index
    %c0_14 = arith.constant 0 : index
    %10 = vector.load %arg2[%c2_12, %c0_13, %c0_14] : memref<3x1x512xf32, #tpu.memory_space<vmem>>, vector<1x1x512xf32>
    %11 = vector.shape_cast %10 : vector<1x1x512xf32> to vector<1x512xf32>
    %12 = arith.addf %1, %3 : vector<1x512xf32>
    %13 = arith.subf %1, %3 : vector<1x512xf32>
    %14 = arith.subf %5, %7 : vector<1x512xf32>
    %15 = arith.subf %9, %11 : vector<1x512xf32>
    %cst = arith.constant 0.249023438 : f32
    %16 = vector.broadcast %cst : f32 to vector<1x512xf32>
    %17 = arith.mulf %16, %12 : vector<1x512xf32>
    %cst_15 = arith.constant 2.49804688 : f32
    %18 = vector.broadcast %cst_15 : f32 to vector<1x512xf32>
    %19 = arith.addf %18, %17 : vector<1x512xf32>
    %20 = arith.mulf %13, %13 : vector<1x512xf32>
    %21 = arith.mulf %19, %20 : vector<1x512xf32>
    %22 = arith.mulf %14, %14 : vector<1x512xf32>
    %cst_16 = arith.constant 4.000000e+00 : f32
    %23 = vector.broadcast %cst_16 : f32 to vector<1x512xf32>
    %24 = arith.mulf %23, %22 : vector<1x512xf32>
    %25 = arith.addf %21, %24 : vector<1x512xf32>
    %cst_17 = arith.constant 2.49804688 : f32
    %26 = vector.broadcast %cst_17 : f32 to vector<1x512xf32>
    %27 = arith.subf %26, %17 : vector<1x512xf32>
    %28 = arith.mulf %15, %15 : vector<1x512xf32>
    %29 = arith.mulf %27, %28 : vector<1x512xf32>
    %30 = arith.addf %25, %29 : vector<1x512xf32>
    %31 = math.sqrt %30 : vector<1x512xf32>
    %cst_18 = arith.constant 1.275000e+02 : f32
    %32 = vector.broadcast %cst_18 : f32 to vector<1x512xf32>
    %33 = arith.mulf %32, %31 : vector<1x512xf32>
    %c0_19 = arith.constant 0 : index
    %c0_20 = arith.constant 0 : index
    %34 = vector.load %arg3[%c0_19, %c0_20] : memref<1x512xf32, #tpu.memory_space<vmem>>, vector<1x512xf32>
    tpu.vector_store %arg3[%c0_19, %c0_20], %33 {strides = array<i32>} : memref<1x512xf32, #tpu.memory_space<vmem>>, vector<1x512xf32>,
    return
  }
  func.func @transform_0(%arg0: i32) -> (i32, i32, i32) {
    %c0_i32 = arith.constant 0 : i32
    %c0_i32_0 = arith.constant 0 : i32
    %c0_i32_1 = arith.constant 0 : i32
    return %c0_i32, %arg0, %c0_i32_0 : i32, i32, i32
  }
  func.func @transform_1(%arg0: i32) -> (i32, i32, i32) {
    %c0_i32 = arith.constant 0 : i32
    %c0_i32_0 = arith.constant 0 : i32
    %c0_i32_1 = arith.constant 0 : i32
    return %c0_i32, %arg0, %c0_i32_0 : i32, i32, i32
  }
  func.func @transform_2(%arg0: i32) -> (i32, i32) {
    %c0_i32 = arith.constant 0 : i32
    %c0_i32_0 = arith.constant 0 : i32
    return %arg0, %c0_i32 : i32, i32
  }
}

</mosaic_0001>

<bundles_post_ra>
// kernel: tpu_custom_call.1
= control target key start
LH: loop header
LB: loop body
LE: loop exit
PB: predicated region body
PF: predicated region fallthrough
CT: control target
= control target key end

     0   :  { %7 = vsyncpa [#allocation3], 0  ;;  %s196_s0 = inlined_call_operand.hbm [shape: f32[3,1,512], index: 0, kind: input, shape index: {}]   ;;  %s197_s1 = inlined_call_operand.hbm [shape: f32[3,1,512], index: 1, kind: input, shape index: {}]   ;;  %s198_s2 = inlined_call_operand.hbm [shape: f32[1,512], index: 2, kind: output, shape index: {}]  }
   0x1   :  { %8 = vsyncpa [#allocation6], 0 }
   0x2   :  { %9 = vsyncpa [#allocation4], 0  ;;  %s167_s9 = smov [#allocation2]  }
   0x3   :  { %s15_s10 = sshll.u32 %s167_s9, 4  ;;  %s16_s10 = int_to_ptr.vmem [resolvable:$true] %s15_s10 }
   0x4   :  { %s109_s11 = scalar_lea.vmem %s16_s10, 192  ;;  %p114_p1 = scmp.lt.s32.totalorder %s16_s10, %s16_s10 }
   0x5   :  { %p110_p0 = scmp.ne.s32.totalorder %s16_s10, %s109_s11  ;;  %p115_p2 = scmp.lt.s32.totalorder %s109_s11, %s109_s11 }
   0x7   :  { %p116_p3 = por %p115_p2, %p114_p1 }
   0x9   :  { %p117_p4 = pnand %p116_p3, %p110_p0 }
   0xb   :  { %120 = shalt.err (!%p117_p4)
}
   0xc   :  { %s168_s12 = smov 64   ;;  %s169_s13 = smov 4  }
   0xd   :  { %21 = dma.hbm_to_vmem [thread:$0]  %s196_s0, 192, %s16_s10, [#allocation3], %s168_s12, %s168_s12, %s169_s13  }
   0xe   :  { %s170_s16 = smov [#allocation5]  }
   0xf   :  { %s27_s17 = sshll.u32 %s170_s16, 4  ;;  %s28_s17 = int_to_ptr.vmem [resolvable:$true] %s27_s17 }
  0x10   :  { %s129_s18 = scalar_lea.vmem %s28_s17, 192  ;;  %p134_p6 = scmp.lt.s32.totalorder %s28_s17, %s28_s17 }
  0x11   :  { %p130_p5 = scmp.ne.s32.totalorder %s28_s17, %s129_s18  ;;  %p135_p7 = scmp.lt.s32.totalorder %s129_s18, %s129_s18 }
  0x13   :  { %p136_p8 = por %p135_p7, %p134_p6 }
  0x15   :  { %p137_p9 = pnand %p136_p8, %p130_p5 }
  0x17   :  { %140 = shalt.err (!%p137_p9)
}
  0x18   :  { %33 = dma.hbm_to_vmem [thread:$0]  %s197_s1, 192, %s28_s17, [#allocation6], %s168_s12, %s168_s12, %s169_s13  }
  0x19   :  { %161 = dma.done.wait [#allocation3], 192  }
  0x1a   :  { %162 = vsyncadd [#allocation3], 4294967104 }
  0x1b   :  { %163 = dma.done.wait [#allocation6], 192  }
  0x1c   :  { %164 = vsyncadd [#allocation6], 4294967104  ;;  %v40_v0 = vld [vmem:[#allocation2] sm:$0xf]  ;;  %v41_v1 = vld [vmem:[#allocation5] sm:$0xf]  ;;  %v73_v23 = vlaneseq }
  0x1d   :  { %v43_v2 = vld [vmem:[#allocation2 + $0x4] sm:$0xf]  ;;  %v45_v3 = vld [vmem:[#allocation5 + $0x4] sm:$0xf]  ;;  %v47_v4 = vld [vmem:[#allocation2 + $0x8] sm:$0xf]  ;;  %v50_v6 = vadd.f32 %v41_v1, %v40_v0  ;;  %v51_v7 = vsub.f32 %v40_v0, %v41_v1 }
  0x1e   :  { %v49_v5 = vld [vmem:[#allocation5 + $0x8] sm:$0xf]  ;;  %v52_v8 = vsub.f32 %v43_v2, %v45_v3  ;;  %s171_s0 = smov [#allocation7]   ;;  %vm75_vm2 = vcmp.lt.s32.totalorder %v73_v23, 512 }
  0x1f   :  { %v53_v9 = vsub.f32 %v47_v4, %v49_v5  ;;  %v54_v10 = vmul.f32 0.24902344, %v50_v6  ;;  %v56_v11 = vmul.f32 %v51_v7, %v51_v7  ;;  %s84_s1 = sshll.u32 %s171_s0, 4  ;;  %s85_s1 = int_to_ptr.vmem [resolvable:$true] %s84_s1 }
  0x20   :  { %v58_v12 = vmul.f32 %v52_v8, %v52_v8  ;;  %s141_s21 = scalar_lea.vmem %s85_s1, 64  ;;  %p146_p11 = scmp.lt.s32.totalorder %s85_s1, %s85_s1 }
  0x21   :  { %v62_v13 = vmul.f32 %v53_v9, %v53_v9  ;;  %v55_v14 = vadd.f32 2.4980469, %v54_v10  ;;  %v61_v15 = vsub.f32 2.4980469, %v54_v10  ;;  %p142_p10 = scmp.ne.s32.totalorder %s85_s1, %s141_s21  ;;  %p147_p12 = scmp.lt.s32.totalorder %s141_s21, %s141_s21 }
  0x22   :  { %v59_v16 = vmul.f32 4.0, %v58_v12 }
  0x23   :  { %v57_v17 = vmul.f32 %v56_v11, %v55_v14  ;;  %v63_v18 = vmul.f32 %v62_v13, %v61_v15  ;;  %p148_p13 = por %p147_p12, %p146_p11 }
  0x25   :  { %v60_v19 = vadd.f32 %v59_v16, %v57_v17  ;;  %p149_p0 = pnand %p148_p13, %p142_p10 }
  0x27   :  { %v64_v20 = vadd.f32 %v63_v18, %v60_v19 }
  0x29   :  { %99 = vrsqrt.f32 %v64_v20  ;;  %vm67_vm0 = vcmp.eq.f32.partialorder %v64_v20, inf  ;;  %v70_v22 = vand.u32 2147483648, %v64_v20  ;;  %vm69_vm1 = vcmp.eq.f32.partialorder %v64_v20, 0.0 }
  0x36   :  { %v100_v21 = vpop.eup %99 }
  0x37   :  { %v66_v24 = vmul.f32 %v100_v21, %v64_v20 }
  0x39   :  { %v68_v25 = vsel %vm67_vm0, %v64_v20, %v66_v24 }
  0x3a   :  { %v71_v26 = vsel %vm69_vm1, %v70_v22, %v68_v25 }
  0x3b   :  { %v72_v27 = vmul.f32 127.5, %v71_v26 }
  0x3d   :  { %77 = vst.msk [vmem:[#allocation7] sm:$0xf] %vm75_vm2, %v72_v27 }
  0x3e   :  { %152 = shalt.err (!%p149_p0)
}
  0x3f   :  { %87 = dma.vmem_to_hbm [thread:$0]  %s85_s1, 64, %s198_s2, [#allocation4]  }
  0x40   :  { %165 = dma.done.wait [#allocation4], 64  }
  0x41   :  { %166 = vsyncadd [#allocation4], 4294967232 }
  0x42   :  { %91 = vsyncpa [#allocation3], 1 }
  0x43   :  { %92 = vsyncpa [#allocation6], 1 }
  0x44   :  { %93 = vsyncpa [#allocation4], 1 }

</bundles_post_ra>
